<compile_context>
chip_gen: v5e
topology: v5e:2x2
jax: 0.10.0
libtpu: 0.0.40
codegen_flags: <defaults>
</compile_context>

<pallas_src>
import functools
import math

import jax
import jax.numpy as jnp
from jax.experimental import pallas as pl
from jax.experimental.pallas import tpu as pltpu


def _round_up(a, m):
    return ((a + m - 1) // m) * m


def _lookahead_kernel(x_ref, halo_ref, w_ref, o_ref, *,
                      rows, halo, bulk, stride, context, n_rows):
    """One (rows, F) output tile of the flattened (T*B, F) problem.

    x_ref:    (rows, F)        current row tile of the flattened input
    halo_ref: (halo, F)        the next `halo` rows (clamped for the last tile)
    w_ref:    (context + 1, F) weight, transposed so F is on the lane axis
    o_ref:    (rows, F)        output tile
    """
    r0 = pl.program_id(0) * rows
    w = w_ref[...].astype(jnp.float32)           # (context + 1, F), tiny

    # A tile is "interior" when every input row any tap touches is < n_rows,
    # i.e. neither the zero-pad region nor a partial/clamped block is visible.
    interior = (r0 + rows + halo) <= n_rows

    @pl.when(interior)
    def _fast():
        # Fast path: no masking, no materialized concatenated window.
        #
        # Bulk: output rows [0, bulk).  Tap c reads rows [c*B, c*B + bulk),
        # which stay inside this tile's x block, so each tap is loaded straight
        # from x_ref with the shift folded into the load addressing.
        if bulk > 0:
            acc = x_ref[pl.ds(0, bulk), :] * w[0:1, :]       # f32 accumulation
            for c in range(1, context + 1):                  # context is small & static
                acc = acc + x_ref[pl.ds(c * stride, bulk), :] * w[c:c + 1, :]
            o_ref[pl.ds(0, bulk), :] = acc.astype(o_ref.dtype)

        # Edge: output rows [bulk, rows).  Their taps live in the last `halo`
        # rows of the x block plus the halo block -> a small (2*halo, F)
        # window; the unaligned tap slices only ever touch this tiny value.
        edge = jnp.concatenate(
            [x_ref[pl.ds(bulk, halo), :], halo_ref[...]], axis=0)
        acc_e = edge[0:halo, :] * w[0:1, :]
        for c in range(1, context + 1):
            acc_e = acc_e + edge[c * stride:c * stride + halo, :] * w[c:c + 1, :]
        o_ref[pl.ds(bulk, halo), :] = acc_e.astype(o_ref.dtype)

    @pl.when(jnp.logical_not(interior))
    def _boundary():
        # Boundary path: runs for at most the last two grid steps per call, so
        # its cost is irrelevant.  Build the full window and zero every row
        # that falls past the end of the flattened input: this implements the
        # module's trailing zero padding (t + c >= seq_len) and neutralizes
        # undefined data in a partial last tile / clamped halo block.
        f = o_ref.shape[-1]
        big = jnp.concatenate([x_ref[...], halo_ref[...]], axis=0)
        row_ids = jax.lax.broadcasted_iota(jnp.int32, (rows + halo, f), 0)
        big = jnp.where(row_ids < (n_rows - r0), big, 0)

        acc = big[0:rows, :] * w[0:1, :]
        for c in range(1, context + 1):
            acc = acc + big[c * stride:c * stride + rows, :] * w[c:c + 1, :]
        o_ref[...] = acc.astype(o_ref.dtype)


def lookahead(x, weight, context, *, rows_per_tile=1024):
    """x: (T, B, F); weight: (F, context + 1). Returns (T, B, F)."""
    T, B, F = x.shape
    C = int(context)
    assert C > 0
    assert weight.shape == (F, C + 1)

    N = T * B
    x2d = x.reshape(N, F)      # free: time-major input is row-major contiguous
    w_t = weight.T             # (C + 1, F): features on the lane axis

    esize = x.dtype.itemsize
    mult = max(8, 32 // esize)                         # sublane multiple (8 f32, 16 bf16)

    # Halo: enough extra rows to cover the furthest tap of the last output row.
    halo = _round_up(max(1, C * B), mult)

    # Generation-aware VMEM budget: limit <= 3/4 of physical VMEM
    # (48 MiB on v7x's 64 MiB, 96 MiB on v5e/v6e's 128 MiB); the pipeline
    # buffers + in-kernel f32 temporaries are budgeted against half of that.
    try:
        vmem_cap = int(pltpu.get_tpu_info().vmem_capacity_bytes)
    except Exception:
        vmem_cap = 64 * 1024 * 1024                    # conservative (v7x) fallback
    vmem_limit = int(min((vmem_cap * 3) // 4, 96 * 1024 * 1024))
    work_budget = vmem_limit // 2

    # Per-row cost of one grid step: double-buffered in/out tiles plus a couple
    # of live f32 temporaries in the tap accumulation chain.
    bytes_per_row = F * (4 * esize + 16)
    max_rows = max(halo, ((work_budget // bytes_per_row) // halo) * halo)

    # Row-tile size: a multiple of `halo` (hence of the sublane multiple), as
    # large as the budget allows to amortize the ~0.35 us per-grid-step cost.
    rows = max(halo, (int(rows_per_tile) // halo) * halo)
    rows = min(rows, max_rows)
    rows = min(rows, _round_up(N, halo))               # don't tile past the data
    # v7x megacore: prefer >= 2 'parallel' grid steps over one jumbo tile.
    if rows >= N and N > 2 * halo:
        rows = max(halo, _round_up((N + 1) // 2, halo))
    bulk = rows - halo

    grid = (pl.cdiv(N, rows),)
    halo_blocks_per_tile = rows // halo                # exact: halo divides rows
    num_halo_blocks = pl.cdiv(N, halo)

    def halo_index_map(i):
        # Block offset (i + 1) * rows, clamped in range for the last tile
        # (whose halo rows all lie past the input; the boundary path masks them).
        return (jnp.minimum((i + 1) * halo_blocks_per_tile, num_halo_blocks - 1), 0)

    kernel = functools.partial(
        _lookahead_kernel, rows=rows, halo=halo, bulk=bulk,
        stride=B, context=C, n_rows=N)

    out2d = pl.pallas_call(
        kernel,
        out_shape=jax.ShapeDtypeStruct((N, F), x.dtype),
        grid_spec=pltpu.PrefetchScalarGridSpec(
            num_scalar_prefetch=0,
            grid=grid,
            in_specs=[
                pl.BlockSpec((rows, F), lambda i: (i, 0)),   # current row tile
                pl.BlockSpec((halo, F), halo_index_map),     # look-ahead halo rows
                pl.BlockSpec((C + 1, F), lambda i: (0, 0)),  # weight (tiny, invariant)
            ],
            out_specs=pl.BlockSpec((rows, F), lambda i: (i, 0)),
        ),
        compiler_params=pltpu.CompilerParams(
            dimension_semantics=("parallel",),               # tiles are independent
            vmem_limit_bytes=vmem_limit),
    )(x2d, x2d, w_t)

    return out2d.reshape(T, B, F)


def lookahead_reference(x, weight, context):
    T, B, F = x.shape
    pad = jnp.zeros((context, B, F), dtype=x.dtype)
    x_pad = jnp.concatenate([x, pad], axis=0)
    # out[t, b, f] = sum_c x_pad[t + c, b, f] * weight[f, c]
    windows = jnp.stack([x_pad[c:c + T] for c in range(context + 1)], axis=-1)
    return jnp.sum(windows * weight[None, None, :, :], axis=-1)


if __name__ == "__main__":
    def run_case(seq_len, batch, n_features, context, rows_per_tile, key):
        k_x, k_w = jax.random.split(key)
        # Deterministic init matching Lookahead.init_parameters:
        # uniform(-stdv, stdv), stdv = 1 / sqrt(context + 1)
        stdv = 1.0 / math.sqrt(context + 1)
        weight = jax.random.uniform(
            k_w, (n_features, context + 1), dtype=jnp.float32,
            minval=-stdv, maxval=stdv)
        x = jax.random.normal(
            k_x, (seq_len, batch, n_features), dtype=jnp.float32)

        out = lookahead(x, weight, context, rows_per_tile=rows_per_tile)
        out = jax.block_until_ready(out)

        ref = lookahead_reference(x, weight, context)
        assert out.shape == (seq_len, batch, n_features)
        assert jnp.allclose(out, ref, atol=1e-5, rtol=1e-5), "mismatch vs reference"

    key = jax.random.PRNGKey(0)
    keys = jax.random.split(key, 3)

    # Interior fast path (bulk + edge) and an exact-fit last tile (clamped halo).
    run_case(48, 2, 128, 3, 32, keys[0])
    # Partial last tile + a second-to-last tile whose halo crosses the end.
    run_case(50, 2, 128, 3, 32, keys[1])
    # Tiny input: a single partial tile, boundary path only.
    run_case(7, 3, 128, 2, 1024, keys[2])

    print("KERNEL_OK")
</pallas_src>

<mosaic_0001>
module attributes {stable_mosaic.version = 11 : i64} {
  func.func @_lookahead_kernel(%arg0: i32, %arg1: memref<32x128xf32, #tpu.memory_space<vmem>>, %arg2: memref<8x128xf32, #tpu.memory_space<vmem>>, %arg3: memref<4x128xf32, #tpu.memory_space<vmem>>, %arg4: memref<32x128xf32, #tpu.memory_space<vmem>>) attributes {dimension_semantics = [#tpu.dimension_semantics<parallel>], iteration_bounds = array<i64: 3>, scalar_prefetch = 0 : i64, scratch_operands = 0 : i64, tpu.core_type = #tpu.core_type<tc>, window_params = [{transform_indices = @transform_0, window_bounds = array<i64: 32, 128>}, {transform_indices = @transform_1, window_bounds = array<i64: 8, 128>}, {pipeline_mode = #tpu.pipeline_mode<synchronous>, transform_indices = @transform_2, window_bounds = array<i64: 4, 128>}, {transform_indices = @transform_3, window_bounds = array<i64: 32, 128>}]} {
    %c32_i32 = arith.constant 32 : i32
    %0 = arith.muli %arg0, %c32_i32 : i32
    %c0 = arith.constant 0 : index
    %c0_0 = arith.constant 0 : index
    %1 = vector.load %arg3[%c0, %c0_0] : memref<4x128xf32, #tpu.memory_space<vmem>>, vector<4x128xf32>
    %c32_i32_1 = arith.constant 32 : i32
    %2 = arith.addi %0, %c32_i32_1 : i32
    %c8_i32 = arith.constant 8 : i32
    %3 = arith.addi %2, %c8_i32 : i32
    %c96_i32 = arith.constant 96 : i32
    %4 = arith.cmpi sle, %3, %c96_i32 : i32
    %5 = arith.extui %4 : i1 to i32
    %c0_i32 = arith.constant 0 : i32
    %6 = arith.cmpi ne, %5, %c0_i32 : i32
    scf.if %6 {
      %c0_3 = arith.constant 0 : index
      %c0_4 = arith.constant 0 : index
      %10 = vector.load %arg1[%c0_3, %c0_4] : memref<32x128xf32, #tpu.memory_space<vmem>>, vector<24x128xf32>
      %11 = vector.extract_strided_slice %1 {offsets = [0, 0], sizes = [1, 128], strides = [1, 1]} : vector<4x128xf32> to vector<1x128xf32>
      %12 = vector.broadcast %11 : vector<1x128xf32> to vector<24x128xf32>
      %13 = arith.mulf %10, %12 : vector<24x128xf32>
      %c2 = arith.constant 2 : index
      %c0_5 = arith.constant 0 : index
      %14 = vector.load %arg1[%c2, %c0_5] : memref<32x128xf32, #tpu.memory_space<vmem>>, vector<24x128xf32>
      %15 = vector.extract_strided_slice %1 {offsets = [1, 0], sizes = [1, 128], strides = [1, 1]} : vector<4x128xf32> to vector<1x128xf32>
      %16 = vector.broadcast %15 : vector<1x128xf32> to vector<24x128xf32>
      %17 = arith.mulf %14, %16 : vector<24x128xf32>
      %18 = arith.addf %13, %17 : vector<24x128xf32>
      %c4 = arith.constant 4 : index
      %c0_6 = arith.constant 0 : index
      %19 = vector.load %arg1[%c4, %c0_6] : memref<32x128xf32, #tpu.memory_space<vmem>>, vector<24x128xf32>
      %20 = vector.extract_strided_slice %1 {offsets = [2, 0], sizes = [1, 128], strides = [1, 1]} : vector<4x128xf32> to vector<1x128xf32>
      %21 = vector.broadcast %20 : vector<1x128xf32> to vector<24x128xf32>
      %22 = arith.mulf %19, %21 : vector<24x128xf32>
      %23 = arith.addf %18, %22 : vector<24x128xf32>
      %c6 = arith.constant 6 : index
      %c0_7 = arith.constant 0 : index
      %24 = vector.load %arg1[%c6, %c0_7] : memref<32x128xf32, #tpu.memory_space<vmem>>, vector<24x128xf32>
      %25 = vector.extract_strided_slice %1 {offsets = [3, 0], sizes = [1, 128], strides = [1, 1]} : vector<4x128xf32> to vector<1x128xf32>
      %26 = vector.broadcast %25 : vector<1x128xf32> to vector<24x128xf32>
      %27 = arith.mulf %24, %26 : vector<24x128xf32>
      %28 = arith.addf %23, %27 : vector<24x128xf32>
      %c0_8 = arith.constant 0 : index
      %c0_9 = arith.constant 0 : index
      %29 = vector.load %arg4[%c0_8, %c0_9] : memref<32x128xf32, #tpu.memory_space<vmem>>, vector<24x128xf32>
      tpu.vector_store %arg4[%c0_8, %c0_9], %28 {strides = array<i32>} : memref<32x128xf32, #tpu.memory_space<vmem>>, vector<24x128xf32>,
      %c24 = arith.constant 24 : index
      %c0_10 = arith.constant 0 : index
      %30 = vector.load %arg1[%c24, %c0_10] : memref<32x128xf32, #tpu.memory_space<vmem>>, vector<8x128xf32>
      %c0_11 = arith.constant 0 : index
      %c0_12 = arith.constant 0 : index
      %31 = vector.load %arg2[%c0_11, %c0_12] : memref<8x128xf32, #tpu.memory_space<vmem>>, vector<8x128xf32>
      %32 = tpu.concatenate %30, %31 in 0 : vector<8x128xf32>, vector<8x128xf32> -> vector<16x128xf32>
      %33 = vector.extract_strided_slice %32 {offsets = [0, 0], sizes = [8, 128], strides = [1, 1]} : vector<16x128xf32> to vector<8x128xf32>
      %34 = vector.extract_strided_slice %1 {offsets = [0, 0], sizes = [1, 128], strides = [1, 1]} : vector<4x128xf32> to vector<1x128xf32>
      %35 = vector.broadcast %34 : vector<1x128xf32> to vector<8x128xf32>
      %36 = arith.mulf %33, %35 : vector<8x128xf32>
      %37 = vector.extract_strided_slice %32 {offsets = [2, 0], sizes = [8, 128], strides = [1, 1]} : vector<16x128xf32> to vector<8x128xf32>
      %38 = vector.extract_strided_slice %1 {offsets = [1, 0], sizes = [1, 128], strides = [1, 1]} : vector<4x128xf32> to vector<1x128xf32>
      %39 = vector.broadcast %38 : vector<1x128xf32> to vector<8x128xf32>
      %40 = arith.mulf %37, %39 : vector<8x128xf32>
      %41 = arith.addf %36, %40 : vector<8x128xf32>
      %42 = vector.extract_strided_slice %32 {offsets = [4, 0], sizes = [8, 128], strides = [1, 1]} : vector<16x128xf32> to vector<8x128xf32>
      %43 = vector.extract_strided_slice %1 {offsets = [2, 0], sizes = [1, 128], strides = [1, 1]} : vector<4x128xf32> to vector<1x128xf32>
      %44 = vector.broadcast %43 : vector<1x128xf32> to vector<8x128xf32>
      %45 = arith.mulf %42, %44 : vector<8x128xf32>
      %46 = arith.addf %41, %45 : vector<8x128xf32>
      %47 = vector.extract_strided_slice %32 {offsets = [6, 0], sizes = [8, 128], strides = [1, 1]} : vector<16x128xf32> to vector<8x128xf32>
      %48 = vector.extract_strided_slice %1 {offsets = [3, 0], sizes = [1, 128], strides = [1, 1]} : vector<4x128xf32> to vector<1x128xf32>
      %49 = vector.broadcast %48 : vector<1x128xf32> to vector<8x128xf32>
      %50 = arith.mulf %47, %49 : vector<8x128xf32>
      %51 = arith.addf %46, %50 : vector<8x128xf32>
      %c24_13 = arith.constant 24 : index
      %c0_14 = arith.constant 0 : index
      %52 = vector.load %arg4[%c24_13, %c0_14] : memref<32x128xf32, #tpu.memory_space<vmem>>, vector<8x128xf32>
      tpu.vector_store %arg4[%c24_13, %c0_14], %51 {strides = array<i32>} : memref<32x128xf32, #tpu.memory_space<vmem>>, vector<8x128xf32>,
    } else {
    }
    %true = arith.constant true
    %7 = arith.xori %4, %true : i1
    %8 = arith.extui %7 : i1 to i32
    %c0_i32_2 = arith.constant 0 : i32
    %9 = arith.cmpi ne, %8, %c0_i32_2 : i32
    scf.if %9 {
      %c0_3 = arith.constant 0 : index
      %c0_4 = arith.constant 0 : index
      %10 = vector.load %arg1[%c0_3, %c0_4] : memref<32x128xf32, #tpu.memory_space<vmem>>, vector<32x128xf32>
      %c0_5 = arith.constant 0 : index
      %c0_6 = arith.constant 0 : index
      %11 = vector.load %arg2[%c0_5, %c0_6] : memref<8x128xf32, #tpu.memory_space<vmem>>, vector<8x128xf32>
      %12 = tpu.concatenate %10, %11 in 0 : vector<32x128xf32>, vector<8x128xf32> -> vector<40x128xf32>
      %13 = tpu.iota {dimensions = array<i32: 0>} : vector<40x128xi32>
      %c96_i32_7 = arith.constant 96 : i32
      %14 = arith.subi %c96_i32_7, %0 : i32
      %15 = vector.broadcast %14 : i32 to vector<40x128xi32>
      %16 = arith.cmpi slt, %13, %15 : vector<40x128xi32>
      %c0_i32_8 = arith.constant 0 : i32
      %17 = arith.sitofp %c0_i32_8 : i32 to f32
      %18 = vector.broadcast %17 : f32 to vector<40x128xf32>
      %19 = arith.select %16, %12, %18 : vector<40x128xi1>, vector<40x128xf32>
      %20 = vector.extract_strided_slice %19 {offsets = [0, 0], sizes = [32, 128], strides = [1, 1]} : vector<40x128xf32> to vector<32x128xf32>
      %21 = vector.extract_strided_slice %1 {offsets = [0, 0], sizes = [1, 128], strides = [1, 1]} : vector<4x128xf32> to vector<1x128xf32>
      %22 = vector.broadcast %21 : vector<1x128xf32> to vector<32x128xf32>
      %23 = arith.mulf %20, %22 : vector<32x128xf32>
      %24 = vector.extract_strided_slice %19 {offsets = [2, 0], sizes = [32, 128], strides = [1, 1]} : vector<40x128xf32> to vector<32x128xf32>
      %25 = vector.extract_strided_slice %1 {offsets = [1, 0], sizes = [1, 128], strides = [1, 1]} : vector<4x128xf32> to vector<1x128xf32>
      %26 = vector.broadcast %25 : vector<1x128xf32> to vector<32x128xf32>
      %27 = arith.mulf %24, %26 : vector<32x128xf32>
      %28 = arith.addf %23, %27 : vector<32x128xf32>
      %29 = vector.extract_strided_slice %19 {offsets = [4, 0], sizes = [32, 128], strides = [1, 1]} : vector<40x128xf32> to vector<32x128xf32>
      %30 = vector.extract_strided_slice %1 {offsets = [2, 0], sizes = [1, 128], strides = [1, 1]} : vector<4x128xf32> to vector<1x128xf32>
      %31 = vector.broadcast %30 : vector<1x128xf32> to vector<32x128xf32>
      %32 = arith.mulf %29, %31 : vector<32x128xf32>
      %33 = arith.addf %28, %32 : vector<32x128xf32>
      %34 = vector.extract_strided_slice %19 {offsets = [6, 0], sizes = [32, 128], strides = [1, 1]} : vector<40x128xf32> to vector<32x128xf32>
      %35 = vector.extract_strided_slice %1 {offsets = [3, 0], sizes = [1, 128], strides = [1, 1]} : vector<4x128xf32> to vector<1x128xf32>
      %36 = vector.broadcast %35 : vector<1x128xf32> to vector<32x128xf32>
      %37 = arith.mulf %34, %36 : vector<32x128xf32>
      %38 = arith.addf %33, %37 : vector<32x128xf32>
      %c0_9 = arith.constant 0 : index
      %c0_10 = arith.constant 0 : index
      %39 = vector.load %arg4[%c0_9, %c0_10] : memref<32x128xf32, #tpu.memory_space<vmem>>, vector<32x128xf32>
      tpu.vector_store %arg4[%c0_9, %c0_10], %38 {strides = array<i32>} : memref<32x128xf32, #tpu.memory_space<vmem>>, vector<32x128xf32>,
    } else {
    }
    return
  }
  func.func @transform_0(%arg0: i32) -> (i32, i32) {
    %c0_i32 = arith.constant 0 : i32
    %c0_i32_0 = arith.constant 0 : i32
    return %arg0, %c0_i32 : i32, i32
  }
  func.func @transform_1(%arg0: i32) -> (i32, i32) {
    %c1_i32 = arith.constant 1 : i32
    %0 = arith.addi %arg0, %c1_i32 : i32
    %c4_i32 = arith.constant 4 : i32
    %1 = arith.muli %0, %c4_i32 : i32
    %c11_i32 = arith.constant 11 : i32
    %2 = arith.minsi %1, %c11_i32 : i32
    %c0_i32 = arith.constant 0 : i32
    %c0_i32_0 = arith.constant 0 : i32
    return %2, %c0_i32 : i32, i32
  }
  func.func @transform_2(%arg0: i32) -> (i32, i32) {
    %c0_i32 = arith.constant 0 : i32
    %c0_i32_0 = arith.constant 0 : i32
    %c0_i32_1 = arith.constant 0 : i32
    return %c0_i32, %c0_i32_0 : i32, i32
  }
  func.func @transform_3(%arg0: i32) -> (i32, i32) {
    %c0_i32 = arith.constant 0 : i32
    %c0_i32_0 = arith.constant 0 : i32
    return %arg0, %c0_i32 : i32, i32
  }
}

</mosaic_0001>

<bundles_post_ra>
// kernel: tpu_custom_call.1
= control target key start
LH: loop header
LB: loop body
LE: loop exit
PB: predicated region body
PF: predicated region fallthrough
CT: control target
= control target key end

     0   :  { %s1244_s0 = inlined_call_operand.hbm [shape: f32[96,128], index: 0, kind: input, shape index: {}]   ;;  %s1245_s1 = inlined_call_operand.hbm [shape: f32[96,128], index: 1, kind: input, shape index: {}]   ;;  %s1246_s2 = inlined_call_operand.hbm [shape: f32[4,128], index: 2, kind: input, shape index: {}]   ;;  %s1247_s3 = inlined_call_operand.hbm [shape: f32[96,128], index: 3, kind: output, shape index: {}]  }
   0x1   :  { %1252 = sst [smem:[#allocation15_spill]] %s1244_s0 }
   0x2   :  { %1253 = sst [smem:[#allocation16_spill]] %s1246_s2 }
   0x3   :  { %8 = vsyncpa [#allocation3], 0 }
   0x4   :  { %10 = vsyncpa [#allocation3 + $0x1], 0 }
   0x5   :  { %11 = vsyncpa [#allocation6], 0 }
   0x6   :  { %13 = vsyncpa [#allocation6 + $0x1], 0 }
   0x7   :  { %14 = vsyncpa [#allocation4], 0 }
   0x8   :  { %16 = vsyncpa [#allocation4 + $0x1], 0  ;;  %s927_s12 = smov 0   ;;  %s929_s13 = smov 0  }
   0x9   :  { %s931_s14 = smov 0   ;;  %s933_s15 = smov 0  }
   0xa   :  { %s935_s16 = smov 0   ;;  %s937_s17 = smov 0  }
   0xb   :  { %s939_s18 = smov 0  }
   0xc LB: > { %1254 = sst [smem:[#allocation13_spill]] %s896_s17  ;;  %s961_s19 = sadd.s32 4294967295, %s900_s18   ;;  %s900_s18 = sphi %s939_s18, %s1277_s18   ;;  %s896_s17 = sphi %s937_s17, %s1271_s17   ;;  %s892_s16 = sphi %s935_s16, %s1276_s16   ;;  %s888_s15 = sphi %s933_s15, %s1275_s15   ;;  %s884_s14 = sphi %s931_s14, %s1274_s14   ;;  %s880_s13 = sphi %s929_s13, %s1273_s13   ;;  %s876_s12 = sphi %s927_s12, %s1272_s12  }
   0xd   : > { %s587_s20 = sadd.s32 4294967294, %s900_s18   ;;  %p42_p0 = scmp.ne.s32.totalorder %s892_s16, %s888_s15 }
   0xe   : > { %p1248_p1 = scmp.eq.s32.totalorder %s961_s19, 0  ;;  %p76_p2 = scmp.ne.s32.totalorder %s880_s13, %s876_s12 }
   0xf   : > { %p121_p3 = scmp.eq.s32.totalorder %s961_s19, 2  ;;  %p127_p5 = scmp.eq.s32.totalorder %s587_s20, 2 }
  0x10   : > { %p971_p4 = por %p1248_p1, %p42_p0  ;;  %p977_p6 = por %p76_p2, %p1248_p1 }
  0x11   : > { %p590_p7 = scmp.ge.s32.totalorder %s900_s18, 1  ;;  %p982_p8 = por %p127_p5, %p42_p0 }
  0x12   : > { %p134_p9 = scmp.lt.s32.totalorder %s900_s18, 4  ;;  %s1258_s2 = sld [smem:[#allocation16_spill]] }
  0x13   : > { %s902_s28 = smov [#allocation7]   ;;  %s999_s30 = sadd.s32 1, %s900_s18  }
  0x14   : > { %p990_p10 = pnand %p590_p7, %p134_p9  ;;  %s148_s29 = sshll.u32 %s902_s28, 4  ;;  %s149_s29 = int_to_ptr.vmem [resolvable:$true] %s148_s29 }
  0x15   : > { %s29_s4 = sadd.s32 1, %s896_s17  ;;  %s26_s5 = ssub.s32 %s900_s18, %s999_s30 }
  0x16   : > { %p632_p11 = pneg %p990_p10  ;;  %p27_p13 = scmp.eq.s32.totalorder %s26_s5, 0 }
  0x17   : > { %p36_p0 = scmp.ne.s32.totalorder %s896_s17, %s892_s16  ;;  %p1250_p2 = scmp.eq.s32.totalorder %s900_s18, 0 }
  0x18   : > { %s146_s26 = sshll.u32 %s1258_s2, 4  ;;  %p633_p12 = pnand %p632_p11, %p1248_p1  ;;  %s147_s26 = int_to_ptr.hbm [resolvable:$true] %s146_s26 }
  0x19   : > { %p1249_p5 = scmp.lt.s32.totalorder %s900_s18, 3  ;;  %p38_p7 = por %p1250_p2, %p36_p0 }
  0x1a   : > { %635 = dma.hbm_to_vmem [thread:$0]  (!%p633_p12), %s147_s26, 64, %s149_s29, [#allocation6]  }
  0x1b   : > { %s1009_s6 = scalar_select %p27_p13, %s896_s17, %s29_s4  }
  0x1c   : > { %p1015_p9 = por %p121_p3, %p36_p0  ;;  %s159_s8 = sand.u32 1, %s896_s17  }
  0x1d   : > { %1260 = sst [smem:[#allocation14_spill]] %s1009_s6  ;;  %s616_s9 = sshll.u32 %s900_s18, 5 }
  0x1e   : > { %s593_s10 = sshll.u32 %s159_s8, 5  ;;  %s1262_s0 = sld [smem:[#allocation15_spill]] }
  0x1f   : > { %s163_s25 = scalar_lea.vmem [#allocation2], %s593_s10  ;;  %p1026_p11 = pnand %p1249_p5, %p38_p7 }
  0x20   : > { %s171_s26 = sshll.u32 %s163_s25, 4  ;;  %s160_s29 = scalar_lea.sflag [#allocation3], %s159_s8  ;;  %s172_s26 = int_to_ptr.vmem [resolvable:$true] %s171_s26 }
  0x21   : > { %p746_p12 = pneg %p1026_p11 }
  0x24   : > { %s168_s20 = scalar_lea.hbm %s1262_s0, %s616_s9  ;;  %s749_s11 = scalar_lea.hbm %s1262_s0, 96 }
  0x25   : > { %s169_s24 = sshll.u32 %s168_s20, 4  ;;  %s170_s24 = int_to_ptr.hbm [resolvable:$true] %s169_s24 }
  0x26   : > { %s742_s4 = sshra.s32 %s170_s24, 4  ;;  %s743_s4 = int_to_ptr.hbm [resolvable:$true] %s742_s4 }
  0x27   : > { %s744_s5 = scalar_lea.hbm %s743_s4, 32  ;;  %p750_p7 = scmp.lt.s32.totalorder %s743_s4, %s1262_s0 }
  0x28   : > { %p745_p3 = scmp.ne.s32.totalorder %s743_s4, %s744_s5  ;;  %p751_p1 = scmp.lt.s32.totalorder %s749_s11, %s744_s5 }
  0x2a   : > { %p747_p13 = pnand %p746_p12, %p745_p3  ;;  %p752_p5 = por %p751_p1, %p750_p7 }
  0x2c   : > { %p748_p0 = pneg %p747_p13 }
  0x2e   : > { %p753_p2 = pnand %p752_p5, %p748_p0 }
  0x30   : > { %756 = shalt.err (!%p753_p2)
}
  0x31   : > { %s903_s8 = smov 128   ;;  %s904_s25 = smov 8  }
  0x32   : > { %639 = dma.hbm_to_vmem [thread:$0]  (!%p1026_p11), %s170_s24, 512, %s172_s26, %s160_s29, %s903_s8, %s903_s8, %s904_s25  }
  0x33   : > { %s612_s9 = sshll.u32 %s900_s18, 2  ;;  %s63_s10 = sadd.s32 1, %s884_s14 }
  0x34   : > { %s613_s4 = sadd.s32 4, %s612_s9  ;;  %p70_p3 = scmp.ne.s32.totalorder %s884_s14, %s880_s13 }
  0x35   : > { %p54_p1 = scmp.lt.s32.totalorder %s613_s4, 11  ;;  %s615_s5 = sadd.s32 4, %s613_s4 }
  0x36   : > { %p58_p2 = scmp.lt.s32.totalorder %s615_s5, 11  ;;  %p1264_p5 = scmp.eq.s32.totalorder %s900_s18, 0 }
  0x37   : > { %s1279_s4 = smov (!%p54_p1, %s613_s4), 11  ;;  %s181_s12 = sand.u32 1, %s900_s18  }
  0x38   : > { %p1046_p12 = por %p70_p3, %p1264_p5  ;;  %s1281_s5 = smov (!%p58_p2, %s615_s5), 11 }
  0x39   : > { %s183_s28 = sand.u32 1, %s884_s14   ;;  %s60_s24 = ssub.s32 %s1279_s4, %s1281_s5 }
  0x3a   : > { %p61_p11 = scmp.eq.s32.totalorder %s60_s24, 0  ;;  %s596_s26 = sshll.u32 %s183_s28, 3 }
  0x3b   : > { %s598_s29 = sshll.u32 %s1279_s4, 3  ;;  %s185_s0 = scalar_lea.vmem [#allocation5], %s596_s26 }
  0x3c   : > { %s1053_s20 = scalar_select %p61_p11, %s884_s14, %s63_s10  }
  0x3d   : > { %s193_s9 = scalar_lea.hbm %s1245_s1, %s598_s29  ;;  %s197_s2 = sshll.u32 %s185_s0, 4  ;;  %s198_s2 = int_to_ptr.vmem [resolvable:$true] %s197_s2 }
  0x3e   : > { %s195_s6 = sshll.u32 %s193_s9, 4  ;;  %p1266_p13 = scmp.lt.s32.totalorder %s900_s18, 3  ;;  %s196_s6 = int_to_ptr.hbm [resolvable:$true] %s195_s6 }
  0x3f   : > { %s182_s5 = scalar_lea.sflag [#allocation6], %s181_s12  ;;  %s772_s4 = sshra.s32 %s196_s6, 4  ;;  %s773_s4 = int_to_ptr.hbm [resolvable:$true] %s772_s4 }
  0x40   : > { %p1062_p0 = pnand %p1266_p13, %p1046_p12  ;;  %s774_s10 = scalar_lea.hbm %s773_s4, 8 }
  0x41   : > { %p775_p7 = scmp.ne.s32.totalorder %s773_s4, %s774_s10  ;;  %s779_s24 = scalar_lea.hbm %s1245_s1, 96 }
  0x42   : > { %p776_p3 = pneg %p1062_p0  ;;  %p780_p5 = scmp.lt.s32.totalorder %s773_s4, %s1245_s1 }
  0x43   : > { %p781_p12 = scmp.lt.s32.totalorder %s779_s24, %s774_s10 }
  0x44   : > { %p777_p1 = pnand %p776_p3, %p775_p7 }
  0x45   : > { %p782_p11 = por %p781_p12, %p780_p5 }
  0x46   : > { %p778_p2 = pneg %p777_p1 }
  0x48   : > { %p783_p13 = pnand %p782_p11, %p778_p2 }
  0x4a   : > { %786 = shalt.err (!%p783_p13)
}
  0x4b   : > { %642 = dma.hbm_to_vmem [thread:$0]  (!%p1062_p0), %s196_s6, 128, %s198_s2, %s182_s5  }
  0x4c   : > { %206 = sbr.rel (%p990_p10) target bundleno = 168 (0xa8), region = 32  ;;  %s1079_s12 = sand.u32 (!%p990_p10), 1, %s892_s16  }
  0x4d   : > { %s600_s29 = sshll.u32 (!%p990_p10), %s1079_s12, 5  ;;  %s209_s8 = scalar_lea.sflag (!%p990_p10), [#allocation3], %s1079_s12 }
  0x4e   : > { %s1083_s25 = scalar_lea.vmem (!%p990_p10), [#allocation2], %s600_s29 }
  0x51   : > { %859 = dma.done.wait (%p971_p4), %s209_s8, 512  }
  0x52   : > { %861 = vsyncadd (%p971_p4), %s209_s8, 4294966784  ;;  %s218_s2 = sand.u32 1, %s961_s19   ;;  %s220_s17 = sand.u32 1, %s880_s13  }
  0x53   : > { %s1091_s27 = sshll.u32 %s220_s17, 3  ;;  %s219_s6 = scalar_lea.sflag [#allocation6], %s218_s2 }
  0x54   : > { %s222_s9 = scalar_lea.vmem [#allocation5], %s1091_s27 }
  0x55   : > { %863 = dma.done.wait (%p977_p6), %s219_s6, 128  }
  0x56   : > { %865 = vsyncadd (%p977_p6), %s219_s6, 4294967168  ;;  %p1268_p10 = scmp.eq.s32.totalorder %s961_s19, 0 }
  0x58   : > { %867 = dma.done.wait (%p1268_p10), [#allocation6], 64   ;;  %p1269_p4 = pmov %p1268_p10 }
  0x59   : > { %s1103_s21 = sshll.u32 %s961_s19, 5  ;;  %v1106_v0 = vld [vmem:[#allocation7] sm:$0xf]  ;;  %s1108_s4 = scalar_lea.vmem [#allocation8], %s600_s29 }
  0x5a   : > { %869 = vsyncadd (%p1269_p4), [#allocation6], 4294967232  ;;  %s264_s5 = sadd.s32 40, %s1103_s21 }
  0x5b   : > { %p605_p0 = scmp.gt.s32.totalorder %s264_s5, 96 }
  0x5d   : > { %268 = sbr.rel (%p605_p0) target bundleno = 116 (0x74), region = 48 }
  0x62   : > { %v269_v1 = vld [vmem:[%s1083_s25] sm:$0xff]  ;;  %v272_v2 = vperm.slane %v1106_v0, 0  ;;  %v279_v4 = vperm.slane %v1106_v0, 1  ;;  %v289_v6 = vperm.slane %v1106_v0, 2  ;;  %v299_v8 = vperm.slane %v1106_v0, 3  ;;  %v270_v9 = vld [vmem:[%s1083_s25 + $0x8] sm:$0xff] }
  0x63   : > { %v276_v3 = vld [vmem:[%s1083_s25 + $0x2] sm:$0xff]  ;;  %v277_v10 = vld [vmem:[%s1083_s25 + $0xa] sm:$0xff]  ;;  %vm316_vm0 = vcmask 1045504   ;;  %vm326_vm1 = vcmask 1043456   ;;  %v278_v22 = vld [vmem:[%s1083_s25 + $0x12] sm:$0xff]  ;;  %vm336_vm2 = vcmask 1041408  }
  0x64   : > { %v286_v5 = vld [vmem:[%s1083_s25 + $0x4] sm:$0xff]  ;;  %v273_v11 = vmul.f32 %v272_v2, %v269_v1  ;;  %v280_v12 = vmul.f32 %v279_v4, %v276_v3  ;;  %v274_v14 = vmul.f32 %v272_v2, %v270_v9  ;;  %v287_v15 = vld [vmem:[%s1083_s25 + $0xc] sm:$0xff]  ;;  %v281_v19 = vmul.f32 %v279_v4, %v277_v10  ;;  %v288_v23 = vld [vmem:[%s1083_s25 + $0x14] sm:$0xff] }
  0x65   : > { %v296_v7 = vld [vmem:[%s1083_s25 + $0x6] sm:$0xff]  ;;  %v290_v13 = vmul.f32 %v289_v6, %v286_v5  ;;  %v297_v16 = vld [vmem:[%s1083_s25 + $0xe] sm:$0xff]  ;;  %v291_v20 = vmul.f32 %v289_v6, %v287_v15  ;;  %v298_v24 = vld [vmem:[%s1083_s25 + $0x16] sm:$0xff]  ;;  %v282_v27 = vmul.f32 %v279_v4, %v278_v22  ;;  %v292_v28 = vmul.f32 %v289_v6, %v288_v23 }
  0x66   : > { %v271_v17 = vld [vmem:[%s1083_s25 + $0x10] sm:$0xff]  ;;  %v300_v18 = vmul.f32 %v299_v8, %v296_v7  ;;  %v301_v21 = vmul.f32 %v299_v8, %v297_v16  ;;  %v283_v25 = vadd.f32 %v280_v12, %v273_v11  ;;  %v309_v29 = vld [vmem:[%s1083_s25 + $0x18] sm:$0xff]  ;;  %v310_v30 = vld [vmem:[%s222_s9] sm:$0xff]  ;;  %v284_v31 = vadd.f32 %v281_v19, %v274_v14 }
  0x67   : > { %v275_v26 = vmul.f32 %v272_v2, %v271_v17  ;;  %v302_v32 = vmul.f32 %v299_v8, %v298_v24  ;;  %v311_v33 = vmul.f32 %v309_v29, %v272_v2  ;;  %v312_v34 = vmul.f32 %v309_v29, %v279_v4 }
  0x68   : > { %v293_v35 = vadd.f32 %v290_v13, %v283_v25  ;;  %v313_v37 = vmul.f32 %v310_v30, %v279_v4  ;;  %v322_v38 = vmul.f32 %v309_v29, %v289_v6  ;;  %v294_v39 = vadd.f32 %v291_v20, %v284_v31 }
  0x69   : > { %v285_v36 = vadd.f32 %v282_v27, %v275_v26  ;;  %v317_v40 = vrot.slane %v312_v34, 2  ;;  %v323_v41 = vmul.f32 %v310_v30, %v289_v6  ;;  %v332_v42 = vmul.f32 %v309_v29, %v299_v8 }
  0x6a   : > { %v303_v43 = vadd.f32 %v300_v18, %v293_v35  ;;  %v318_v45 = vrot.slane %v313_v37, 2  ;;  %v327_v46 = vrot.slane %v322_v38, 4  ;;  %v304_v47 = vadd.f32 %v301_v21, %v294_v39 }
  0x6b   : > { %v295_v44 = vadd.f32 %v292_v28, %v285_v36  ;;  %v328_v48 = vrot.slane %v323_v41, 4  ;;  %v333_v49 = vmul.f32 %v310_v30, %v299_v8  ;;  %v337_v52 = vrot.slane %v332_v42, 6 }
  0x6c   : > { %306 = vst [vmem:[%s1108_s4] sm:$0xff] %v303_v43  ;;  %v319_v51 = vsel %vm316_vm0, %v317_v40, %v318_v45 }
  0x6d   : > { %v305_v50 = vadd.f32 %v302_v32, %v295_v44  ;;  %307 = vst [vmem:[%s1108_s4 + $0x8] sm:$0xff] %v304_v47  ;;  %v321_v53 = vadd.f32 %v319_v51, %v311_v33  ;;  %v329_v54 = vsel %vm326_vm1, %v327_v46, %v328_v48  ;;  %v338_v55 = vrot.slane %v333_v49, 6 }
  0x6f   : > { %308 = vst [vmem:[%s1108_s4 + $0x10] sm:$0xff] %v305_v50  ;;  %v331_v56 = vadd.f32 %v329_v54, %v321_v53  ;;  %v339_v57 = vsel %vm336_vm2, %v337_v52, %v338_v55 }
  0x71   : > { %v341_v58 = vadd.f32 %v339_v57, %v331_v56 }
  0x73   : > { %342 = vst [vmem:[%s1108_s4 + $0x18] sm:$0xff] %v341_v58 }
  0x74 PF: > { %p606_p6 = scmp.le.s32.totalorder %s264_s5, 96 }
  0x75   : > { %s358_s19 = ssub.s32 (!%p606_p6), 96, %s1103_s21 }
  0x76   : > { %346 = sbr.rel (%p606_p6) target bundleno = 153 (0x99), region = 52 }
  0x7b   : > { %v352_v59 = vlaneseq  ;;  %v1140_v60 = vstv %s358_s19  ;;  %v347_v61 = vld [vmem:[%s1083_s25] sm:$0xff]  ;;  %v1144_v63 = vperm.slane %v1106_v0, 0  ;;  %v1147_v1 = vperm.slane %v1106_v0, 1  ;;  %v348_v4 = vld [vmem:[%s1083_s25 + $0x8] sm:$0xff]  ;;  %v349_v12 = vld [vmem:[%s1083_s25 + $0x10] sm:$0xff] }
  0x7c   : > { %v1150_v2 = vperm.slane %v1106_v0, 2  ;;  %vm386_vm3 = vcmask 1045504   ;;  %v1153_v3 = vperm.slane %v1106_v0, 3  ;;  %vm415_vm5 = vcmask 1043456   ;;  %v350_v19 = vld [vmem:[%s1083_s25 + $0x18] sm:$0xff]  ;;  %v351_v44 = vld [vmem:[%s222_s9] sm:$0xff] }
  0x7d   : > { %v353_v62 = vshrl.u32 %v352_v59, 7  ;;  %vm444_vm6 = vcmask 1041408  }
  0x7f   : > { %v354_v5 = vadd.s32 8, %v353_v62  ;;  %vm360_vm4 = vcmp.lt.s32.totalorder %v353_v62, %v1140_v60  ;;  %v355_v6 = vadd.s32 16, %v353_v62  ;;  %v356_v7 = vadd.s32 24, %v353_v62 }
  0x80   : > { %v365_v8 = vsel %vm360_vm4, %v347_v61, 0.0  ;;  %v357_v9 = vadd.s32 32, %v353_v62 }
  0x81   : > { %vm361_vm7 = vcmp.lt.s32.totalorder %v354_v5, %v1140_v60  ;;  %v371_v10 = vmul.f32 %v1144_v63, %v365_v8  ;;  %v376_v11 = vmul.f32 %v1147_v1, %v365_v8  ;;  %v405_v0 = vmul.f32 %v1150_v2, %v365_v8 }
  0x82   : > { %v366_v13 = vsel %vm361_vm7, %v348_v4, 0.0  ;;  %v434_v14 = vmul.f32 %v1153_v3, %v365_v8  ;;  %vm362_vm8 = vcmp.lt.s32.totalorder %v355_v6, %v1140_v60  ;;  %vm363_vm9 = vcmp.lt.s32.totalorder %v356_v7, %v1140_v60 }
  0x83   : > { %v377_v15 = vmul.f32 %v1147_v1, %v366_v13  ;;  %v387_v16 = vrot.slane %v376_v11, 2  ;;  %v406_v17 = vmul.f32 %v1150_v2, %v366_v13  ;;  %v416_v18 = vrot.slane %v405_v0, 4 }
  0x84   : > { %v435_v20 = vmul.f32 %v1153_v3, %v366_v13  ;;  %v445_v21 = vrot.slane %v434_v14, 6  ;;  %v367_v22 = vsel %vm362_vm8, %v349_v12, 0.0  ;;  %v372_v23 = vmul.f32 %v1144_v63, %v366_v13 }
  0x85   : > { %v388_v24 = vrot.slane %v377_v15, 2  ;;  %v417_v25 = vrot.slane %v406_v17, 4  ;;  %v378_v26 = vmul.f32 %v1147_v1, %v367_v22  ;;  %v407_v27 = vmul.f32 %v1150_v2, %v367_v22 }
  0x86   : > { %v446_v28 = vrot.slane %v435_v20, 6  ;;  %v436_v29 = vmul.f32 %v1153_v3, %v367_v22  ;;  %v368_v30 = vsel %vm363_vm9, %v350_v19, 0.0  ;;  %v373_v31 = vmul.f32 %v1144_v63, %v367_v22 }
  0x87   : > { %v389_v32 = vsel %vm386_vm3, %v387_v16, %v388_v24  ;;  %v418_v33 = vsel %vm415_vm5, %v416_v18, %v417_v25  ;;  %v390_v34 = vrot.slane %v378_v26, 2  ;;  %v419_v35 = vrot.slane %v407_v27, 4 }
  0x88   : > { %v400_v36 = vadd.f32 %v389_v32, %v371_v10  ;;  %v447_v37 = vsel %vm444_vm6, %v445_v21, %v446_v28  ;;  %v448_v38 = vrot.slane %v436_v29, 6  ;;  %v379_v39 = vmul.f32 %v1147_v1, %v368_v30 }
  0x89   : > { %v391_v40 = vsel %vm386_vm3, %v388_v24, %v390_v34  ;;  %v420_v41 = vsel %vm415_vm5, %v417_v25, %v419_v35  ;;  %v408_v42 = vmul.f32 %v1150_v2, %v368_v30  ;;  %v437_v43 = vmul.f32 %v1153_v3, %v368_v30 }
  0x8a   : > { %v429_v45 = vadd.f32 %v418_v33, %v400_v36  ;;  %v401_v46 = vadd.f32 %v391_v40, %v372_v23  ;;  %v392_v47 = vrot.slane %v379_v39, 2  ;;  %v449_v48 = vsel %vm444_vm6, %v446_v28, %v448_v38 }
  0x8b   : > { %v421_v49 = vrot.slane %v408_v42, 4  ;;  %v450_v50 = vrot.slane %v437_v43, 6  ;;  %vm364_vm10 = vcmp.lt.s32.totalorder %v357_v9, %v1140_v60  ;;  %v374_v57 = vmul.f32 %v1144_v63, %v368_v30 }
  0x8c   : > { %v458_v51 = vadd.f32 %v447_v37, %v429_v45  ;;  %v430_v52 = vadd.f32 %v420_v41, %v401_v46  ;;  %v393_v53 = vsel %vm386_vm3, %v390_v34, %v392_v47  ;;  %v369_v54 = vsel %vm364_vm10, %v351_v44, 0.0 }
  0x8d   : > { %v402_v55 = vadd.f32 %v393_v53, %v373_v31  ;;  %v422_v56 = vsel %vm415_vm5, %v419_v35, %v421_v49  ;;  %v380_v58 = vmul.f32 %v1147_v1, %v369_v54  ;;  %v451_v61 = vsel %vm444_vm6, %v448_v38, %v450_v50 }
  0x8e   : > { %462 = vst [vmem:[%s1108_s4] sm:$0xff] %v458_v51  ;;  %v459_v59 = vadd.f32 %v449_v48, %v430_v52  ;;  %v409_v60 = vmul.f32 %v1150_v2, %v369_v54  ;;  %v438_v62 = vmul.f32 %v1153_v3, %v369_v54 }
  0x8f   : > { %v431_v4 = vadd.f32 %v422_v56, %v402_v55  ;;  %v394_v5 = vrot.slane %v380_v58, 2 }
  0x90   : > { %463 = vst [vmem:[%s1108_s4 + $0x8] sm:$0xff] %v459_v59  ;;  %v423_v6 = vrot.slane %v409_v60, 4  ;;  %v452_v7 = vrot.slane %v438_v62, 6 }
  0x91   : > { %v460_v8 = vadd.f32 %v451_v61, %v431_v4  ;;  %v395_v63 = vsel %vm386_vm3, %v392_v47, %v394_v5 }
  0x92   : > { %v403_v9 = vadd.f32 %v395_v63, %v374_v57  ;;  %v424_v1 = vsel %vm415_vm5, %v421_v49, %v423_v6  ;;  %v453_v10 = vsel %vm444_vm6, %v450_v50, %v452_v7 }
  0x93   : > { %464 = vst [vmem:[%s1108_s4 + $0x10] sm:$0xff] %v460_v8 }
  0x94   : > { %v432_v11 = vadd.f32 %v424_v1, %v403_v9 }
  0x96   : > { %v461_v0 = vadd.f32 %v453_v10, %v432_v11 }
  0x98   : > { %465 = vst [vmem:[%s1108_s4 + $0x18] sm:$0xff] %v461_v0 }
  0x99 PF: > { %s478_s0 = scalar_lea.hbm %s1247_s3, %s1103_s21  ;;  %s479_s28 = sshll.u32 %s1108_s4, 4  ;;  %s480_s28 = int_to_ptr.vmem [resolvable:$true] %s479_s28 }
  0x9a   : > { %s481_s24 = sshll.u32 %s478_s0, 4  ;;  %s467_s11 = scalar_lea.sflag [#allocation4], %s1079_s12  ;;  %s482_s24 = int_to_ptr.hbm [resolvable:$true] %s481_s24 }
  0x9b   : > { %s816_s26 = sshra.s32 %s482_s24, 4  ;;  %s822_s2 = scalar_lea.hbm %s1247_s3, 96  ;;  %s817_s26 = int_to_ptr.hbm [resolvable:$true] %s816_s26 }
  0x9c   : > { %s818_s29 = scalar_lea.hbm %s817_s26, 32  ;;  %p823_p2 = scmp.lt.s32.totalorder %s817_s26, %s1247_s3 }
  0x9d   : > { %p819_p7 = scmp.ne.s32.totalorder %s817_s26, %s818_s29  ;;  %p824_p5 = scmp.lt.s32.totalorder %s822_s2, %s818_s29 }
  0x9f   : > { %p820_p3 = pnand %p819_p7, %p1015_p9  ;;  %p825_p12 = por %p824_p5, %p823_p2 }
  0xa1   : > { %p821_p1 = pneg %p820_p3 }
  0xa3   : > { %p826_p11 = pnand %p825_p12, %p821_p1 }
  0xa5   : > { %829 = shalt.err (!%p826_p11)
}
  0xa6   : > { %s905_s12 = smov 128   ;;  %s906_s6 = smov 8  }
  0xa7   : > { %630 = dma.vmem_to_hbm [thread:$0]  (%p1015_p9), %s480_s28, 512, %s482_s24, %s467_s11, %s905_s12, %s905_s12, %s906_s6  }
  0xa8 PF: > { %p650_p13 = scmp.ge.s32.totalorder %s900_s18, 2  ;;  %s496_s9 = sand.u32 1, %s888_s15  }
  0xa9   : > { %s497_s21 = scalar_lea.sflag [#allocation4], %s496_s9 }
  0xaa   : > { %p644_p10 = pnand %p650_p13, %p982_p8 }
  0xac   : > { %p645_p4 = pneg %p644_p10 }
  0xae   : > { %871 = dma.done.wait (%p645_p4), %s497_s21, 512  }
  0xaf   : > { %873 = vsyncadd (%p645_p4), %s497_s21, 4294966784  ;;  %s1270_s5 = sld [smem:[#allocation13_spill]]  ;;  %p19_p9 = scmp.ge.s32.totalorder %s999_s30, 5  }
  0xb0   : > { %s1271_s17 = sld [smem:[#allocation14_spill]]  ;;  %s1272_s12 = smov %s880_s13 }
  0xb1   : > { %s1273_s13 = smov %s884_s14  ;;  %s1274_s14 = smov %s1053_s20 }
  0xb2   : > { %s1275_s15 = smov %s892_s16  ;;  %s1277_s18 = smov %s999_s30 }
  0xb3   :  { %21 = sbr.rel (!%p19_p9) target bundleno = 12 (0xc), region = 102 }
  0xb5   : > { %s1276_s16 = smov %s1270_s5 }
  0xb8   :  { %503 = vsyncpa [#allocation3], 1 }
  0xb9   :  { %505 = vsyncpa [#allocation3 + $0x1], 1 }
  0xba   :  { %506 = vsyncpa [#allocation6], 1 }
  0xbb   :  { %508 = vsyncpa [#allocation6 + $0x1], 1 }
  0xbc   :  { %509 = vsyncpa [#allocation4], 1 }
  0xbd   :  { %511 = vsyncpa [#allocation4 + $0x1], 1 }

</bundles_post_ra>
